<compile_context>
chip_gen: v6e
topology: v6e:2x2x1
jax: 0.10.0
libtpu: 0.0.40
codegen_flags: <defaults>
</compile_context>

<pallas_src>
import math
from functools import partial

import jax
import jax.numpy as jnp
from jax.experimental import pallas as pl
from jax.experimental.pallas import tpu as pltpu


_VMEM_LIMIT_BYTES = 48 * 1024 * 1024  # > scoped defaults (16/32 MiB), < v7x 64 MiB physical


# ----------------------------- linear (matmul) kernels ------------------------


def _linear_kernel(x_ref, w_ref, o_ref, *, compute_dtype):
    # x_ref: (1, TN, K) (any float dtype), w_ref: (K, TC) compute_dtype, o_ref: (1, TN, TC)
    xb = x_ref[0].astype(compute_dtype)          # fused cast (no separate HBM cast pass)
    o_ref[0] = jnp.dot(
        xb, w_ref[...], preferred_element_type=jnp.float32
    ).astype(o_ref.dtype)


def _linear_bias_kernel(x_ref, w_ref, b_ref, o_ref, *, compute_dtype):
    # x_ref: (1, TN, K), w_ref: (K, TC), b_ref: (1, TC) f32, o_ref: (1, TN, TC)
    xb = x_ref[0].astype(compute_dtype)
    y = jnp.dot(xb, w_ref[...], preferred_element_type=jnp.float32)
    o_ref[0] = (y + b_ref[...].astype(jnp.float32)).astype(o_ref.dtype)


def _pick_tile(dim, align, target):
    """Largest multiple of `align` that divides `dim` and is <= target, else full `dim`."""
    if dim % align != 0 or dim <= target:
        return dim
    t = (target // align) * align
    while t >= align:
        if dim % t == 0:
            return t
        t -= align
    return dim


def _linear(x, w, b, *, out_dtype, compute_dtype, tn_target=512, tc_target=512,
            resident_weight_bytes=8 * 1024 * 1024):
    """y = x @ w (+ b).  Weight is kept VMEM-resident (constant index map) when it fits;
    otherwise the weight-column axis is the outer grid axis so each column slab is reused
    across all row slabs instead of being re-read from HBM every row tile."""
    B, N, K = x.shape
    _, OUTC = w.shape
    row_align = 16 if compute_dtype == jnp.bfloat16 else 8
    tn = _pick_tile(N, row_align, tn_target)
    w_bytes = K * OUTC * jnp.dtype(w.dtype).itemsize

    kernel_fn = _linear_bias_kernel if b is not None else _linear_kernel
    kernel = partial(kernel_fn, compute_dtype=compute_dtype)

    if w_bytes <= resident_weight_bytes:
        # Full weight resident in VMEM; DMA'd once for the whole grid.
        grid = (B, N // tn)
        x_spec = pl.BlockSpec((1, tn, K), lambda bb, i: (bb, i, 0))
        w_spec = pl.BlockSpec((K, OUTC), lambda bb, i: (0, 0))
        o_spec = pl.BlockSpec((1, tn, OUTC), lambda bb, i: (bb, i, 0))
        b_spec = pl.BlockSpec((1, OUTC), lambda bb, i: (0, 0))
        dims = ("parallel", "parallel")
    else:
        # Column-slab axis OUTER, row-slab axis inner -> weight block reused across all
        # row slabs before moving to the next column slab.
        tc = _pick_tile(OUTC, 128, tc_target)
        grid = (B, OUTC // tc, N // tn)
        x_spec = pl.BlockSpec((1, tn, K), lambda bb, j, i: (bb, i, 0))
        w_spec = pl.BlockSpec((K, tc), lambda bb, j, i: (0, j))
        o_spec = pl.BlockSpec((1, tn, tc), lambda bb, j, i: (bb, i, j))
        b_spec = pl.BlockSpec((1, tc), lambda bb, j, i: (0, j))
        dims = ("parallel", "parallel", "parallel")

    in_specs = [x_spec, w_spec]
    operands = [x, w]
    if b is not None:
        in_specs.append(b_spec)
        operands.append(b.reshape(1, OUTC))

    return pl.pallas_call(
        kernel,
        out_shape=jax.ShapeDtypeStruct((B, N, OUTC), out_dtype),
        grid=grid,
        in_specs=in_specs,
        out_specs=o_spec,
        compiler_params=pltpu.CompilerParams(
            dimension_semantics=dims,
            vmem_limit_bytes=_VMEM_LIMIT_BYTES,
        ),
    )(*operands)


# ----------------------------- attention kernels ------------------------------


def _mha_qtile(q, k, v, heads, head_dim, scale, out_dtype):
    """q: (TQ, heads*head_dim); k/v: (N, heads*head_dim) MXU-dtype. Returns (TQ, heads*head_dim)."""
    outs = []
    for h in range(heads):
        lo = h * head_dim
        hi = lo + head_dim
        qh = q[:, lo:hi] * scale          # fold softmax scale into q (TQ*D muls, not TQ*N)
        kh = k[:, lo:hi]
        vh = v[:, lo:hi]
        # scores via dot_general contracting the last dims (no materialized K^T)
        s = jax.lax.dot_general(
            qh, kh, (((1,), (1,)), ((), ())), preferred_element_type=jnp.float32
        )  # (TQ, N) f32
        # numerically-stable softmax in f32, normalization DEFERRED past the PV matmul
        m = jnp.max(s, axis=-1, keepdims=True)
        p = jnp.exp(s - m)                                  # unnormalized probabilities
        l = jnp.sum(p, axis=-1, keepdims=True)              # (TQ, 1) row sums
        o_h = jnp.dot(p.astype(vh.dtype), vh, preferred_element_type=jnp.float32)
        o_h = o_h * pl.reciprocal(l)                        # TQ*D muls instead of TQ*N
        outs.append(o_h.astype(out_dtype))                  # cast per head before concat
    return outs[0] if len(outs) == 1 else jnp.concatenate(outs, axis=-1)


def _attn_kernel_grouped(q_ref, k_ref, v_ref, o_ref, *, heads, head_dim, scale):
    # q/o refs: (1, TQ, W) query tile; k/v refs: (1, N, W) full keys/values for this
    # 128-lane head group, sliced straight out of the packed (B, N, 3C) qkv tensor.
    o_ref[0] = _mha_qtile(
        q_ref[0], k_ref[0], v_ref[0], heads, head_dim, scale, o_ref.dtype
    )


def _attn_kernel_packed(qkv_ref, o_ref, *, heads, head_dim, scale):
    # Fallback for channel counts that are not 128-lane aligned: one step per batch
    # reads the whole (1, N, 3C) slab and slices q/k/v in VMEM.
    C = heads * head_dim
    x = qkv_ref[0]
    o_ref[0] = _mha_qtile(
        x[:, 0:C], x[:, C:2 * C], x[:, 2 * C:3 * C], heads, head_dim, scale, o_ref.dtype
    )


# ----------------------------- forward wrapper --------------------------------


def attention_forward(x, w_qkv, w_proj, b_proj, *, num_heads,
                      compute_dtype=jnp.bfloat16, tq_target=256):
    """Pallas implementation of Attention.forward.

    x:      (B, N, C) float32
    w_qkv:  (C, 3C)   (pre-transposed: qkv = x @ w_qkv, qkv_bias=False)
    w_proj: (C, C)    (y = x @ w_proj + b_proj)
    b_proj: (C,)      kept in f32 on the bias path
    """
    B, N, C = x.shape
    H = num_heads
    D = C // H
    scale = float(D) ** -0.5
    out_dtype = x.dtype

    # Weights cast once to the MXU dtype (halves weight HBM traffic; accumulation stays f32).
    wq = w_qkv.astype(compute_dtype)
    wp = w_proj.astype(compute_dtype)

    # ---- qkv projection: (B, N, C) @ (C, 3C) -> (B, N, 3C); x->bf16 cast fused in-kernel ----
    qkv = _linear(x, wq, None, out_dtype=compute_dtype, compute_dtype=compute_dtype)

    # ---- fused scaled-dot-product attention, reading q/k/v straight from qkv ----
    lane_dense = (C % 128 == 0) and (128 % D == 0 or D % 128 == 0)
    if lane_dense:
        W = 128 if D <= 128 else D          # lane-dense head-group width
        heads_per_group = W // D
        G = C // W                          # number of head groups
        TQ = _pick_tile(N, 16 if compute_dtype == jnp.bfloat16 else 8, tq_target)
        # Query axis innermost: k/v index maps are independent of qi, so the full-N k/v
        # blocks stay VMEM-resident across all query tiles of a head group.
        attn_out = pl.pallas_call(
            partial(_attn_kernel_grouped, heads=heads_per_group,
                    head_dim=D, scale=scale),
            out_shape=jax.ShapeDtypeStruct((B, N, C), compute_dtype),
            grid=(B, G, N // TQ),
            in_specs=[
                pl.BlockSpec((1, TQ, W), lambda b, g, qi: (b, qi, g)),          # q tile
                pl.BlockSpec((1, N, W), lambda b, g, qi: (b, 0, G + g)),        # k (resident)
                pl.BlockSpec((1, N, W), lambda b, g, qi: (b, 0, 2 * G + g)),    # v (resident)
            ],
            out_specs=pl.BlockSpec((1, TQ, W), lambda b, g, qi: (b, qi, g)),
            compiler_params=pltpu.CompilerParams(
                dimension_semantics=("parallel", "parallel", "parallel"),
                vmem_limit_bytes=_VMEM_LIMIT_BYTES,
            ),
        )(qkv, qkv, qkv)
    else:
        # TODO(synk): non-lane-aligned fallback keeps the full (N, N) scores per batch;
        #             only meant for small C / N (validate separately before production use).
        attn_out = pl.pallas_call(
            partial(_attn_kernel_packed, heads=H, head_dim=D, scale=scale),
            out_shape=jax.ShapeDtypeStruct((B, N, C), compute_dtype),
            grid=(B,),
            in_specs=[pl.BlockSpec((1, N, 3 * C), lambda b: (b, 0, 0))],
            out_specs=pl.BlockSpec((1, N, C), lambda b: (b, 0, 0)),
            compiler_params=pltpu.CompilerParams(
                dimension_semantics=("parallel",),
                vmem_limit_bytes=_VMEM_LIMIT_BYTES,
            ),
        )(qkv)

    # ---- output projection (+bias in f32), cast back to the input dtype ----
    out = _linear(attn_out, wp, b_proj.astype(jnp.float32),
                  out_dtype=out_dtype, compute_dtype=compute_dtype)

    # attn_drop / proj_drop with p=0.0 are identities -> no-op.
    return out


# ----------------------------- reference (plain JAX, f32) ----------------------


def attention_ref(x, w_qkv, w_proj, b_proj, *, num_heads):
    B, N, C = x.shape
    H = num_heads
    D = C // H
    scale = D ** (-0.5)
    qkv = (x @ w_qkv).reshape(B, N, 3, H, D).transpose(2, 0, 3, 1, 4)
    q, k, v = qkv[0], qkv[1], qkv[2]
    attn = jnp.einsum("bhnd,bhmd->bhnm", q, k) * scale
    attn = jax.nn.softmax(attn, axis=-1)
    o = jnp.einsum("bhnm,bhmd->bhnd", attn, v)
    o = o.transpose(0, 2, 1, 3).reshape(B, N, C)
    return o @ w_proj + b_proj


# ----------------------------- main -------------------------------------------

if __name__ == "__main__":
    # First config exercises the lane-dense query-tiled path (C % 128 == 0, two D=64
    # heads per 128-lane block); second exercises the small-channel packed fallback.
    configs = [
        (2, 16, 256, 4),
        (2, 8, 32, 4),
    ]

    key = jax.random.PRNGKey(0)
    for (B, N, C, H) in configs:
        key, kx, kq, kp, kb = jax.random.split(key, 5)
        bound = 1.0 / math.sqrt(C)
        x = jax.random.normal(kx, (B, N, C), dtype=jnp.float32)
        w_qkv = jax.random.uniform(
            kq, (C, 3 * C), minval=-bound, maxval=bound, dtype=jnp.float32
        )
        w_proj = jax.random.uniform(
            kp, (C, C), minval=-bound, maxval=bound, dtype=jnp.float32
        )
        b_proj = jax.random.uniform(
            kb, (C,), minval=-bound, maxval=bound, dtype=jnp.float32
        )

        out = attention_forward(x, w_qkv, w_proj, b_proj, num_heads=H)
        out = jax.block_until_ready(out)
        ref = attention_ref(x, w_qkv, w_proj, b_proj, num_heads=H)

        assert out.shape == (B, N, C)
        # bf16 MXU operands with f32 accumulation -> relaxed tolerance vs f32 reference.
        max_err = jnp.max(jnp.abs(out - ref))
        assert jnp.allclose(out, ref, atol=5e-2, rtol=5e-2), (
            f"mismatch vs reference (B={B}, N={N}, C={C}): max abs err {max_err}"
        )

    print("KERNEL_OK")
</pallas_src>

<mosaic_0001>
module attributes {stable_mosaic.version = 11 : i64} {
  func.func @_linear_kernel(%arg0: i32, %arg1: i32, %arg2: memref<1x16x256xf32, #tpu.memory_space<vmem>>, %arg3: memref<256x768xbf16, #tpu.memory_space<vmem>>, %arg4: memref<1x16x768xbf16, #tpu.memory_space<vmem>>) attributes {dimension_semantics = [#tpu.dimension_semantics<parallel>, #tpu.dimension_semantics<parallel>], iteration_bounds = array<i64: 2, 1>, scalar_prefetch = 0 : i64, scratch_operands = 0 : i64, tpu.core_type = #tpu.core_type<tc>, window_params = [{transform_indices = @transform_0, window_bounds = array<i64: 1, 16, 256>}, {pipeline_mode = #tpu.pipeline_mode<synchronous>, transform_indices = @transform_1, window_bounds = array<i64: 256, 768>}, {transform_indices = @transform_2, window_bounds = array<i64: 1, 16, 768>}]} {
    %c0 = arith.constant 0 : index
    %c0_0 = arith.constant 0 : index
    %c0_1 = arith.constant 0 : index
    %0 = vector.load %arg2[%c0, %c0_0, %c0_1] : memref<1x16x256xf32, #tpu.memory_space<vmem>>, vector<1x16x256xf32>
    %1 = vector.shape_cast %0 : vector<1x16x256xf32> to vector<16x256xf32>
    %2 = arith.truncf %1 : vector<16x256xf32> to vector<16x256xbf16>
    %c0_2 = arith.constant 0 : index
    %c0_3 = arith.constant 0 : index
    %3 = vector.load %arg3[%c0_2, %c0_3] : memref<256x768xbf16, #tpu.memory_space<vmem>>, vector<256x768xbf16>
    %cst = arith.constant dense<0.000000e+00> : vector<16x768xf32>
    %4 = tpu.matmul %2, %3, %cst {dimension_numbers = #tpu.dot_dimension_numbers<[1], [0], [0], [1], [0, 0, 1, 1], [], []>} : vector<16x256xbf16>, vector<256x768xbf16>, vector<16x768xf32> -> vector<16x768xf32>
    %5 = arith.truncf %4 : vector<16x768xf32> to vector<16x768xbf16>
    %c0_4 = arith.constant 0 : index
    %c0_5 = arith.constant 0 : index
    %c0_6 = arith.constant 0 : index
    %6 = vector.load %arg4[%c0_4, %c0_5, %c0_6] : memref<1x16x768xbf16, #tpu.memory_space<vmem>>, vector<1x16x768xbf16>
    %7 = vector.shape_cast %6 : vector<1x16x768xbf16> to vector<16x768xbf16>
    %8 = vector.shape_cast %5 : vector<16x768xbf16> to vector<1x16x768xbf16>
    tpu.vector_store %arg4[%c0_4, %c0_5, %c0_6], %8 {strides = array<i32>} : memref<1x16x768xbf16, #tpu.memory_space<vmem>>, vector<1x16x768xbf16>,
    return
  }
  func.func @transform_0(%arg0: i32, %arg1: i32) -> (i32, i32, i32) {
    %c0_i32 = arith.constant 0 : i32
    %c0_i32_0 = arith.constant 0 : i32
    return %arg0, %arg1, %c0_i32 : i32, i32, i32
  }
  func.func @transform_1(%arg0: i32, %arg1: i32) -> (i32, i32) {
    %c0_i32 = arith.constant 0 : i32
    %c0_i32_0 = arith.constant 0 : i32
    %c0_i32_1 = arith.constant 0 : i32
    return %c0_i32, %c0_i32_0 : i32, i32
  }
  func.func @transform_2(%arg0: i32, %arg1: i32) -> (i32, i32, i32) {
    %c0_i32 = arith.constant 0 : i32
    %c0_i32_0 = arith.constant 0 : i32
    return %arg0, %arg1, %c0_i32 : i32, i32, i32
  }
}

</mosaic_0001>

<bundles_post_ra>
// kernel: tpu_custom_call.1
= control target key start
LH: loop header
LB: loop body
LE: loop exit
PB: predicated region body
PF: predicated region fallthrough
CT: control target
= control target key end

     0   :  { %7 = vsyncpa [#allocation3], 0  ;;  %s1775_s0 = inlined_call_operand.hbm [shape: f32[2,16,256], index: 0, kind: input, shape index: {}]   ;;  %s1776_s1 = inlined_call_operand.hbm [shape: bf16[256,768], index: 1, kind: input, shape index: {}]   ;;  %s1777_s2 = inlined_call_operand.hbm [shape: bf16[2,16,768], index: 2, kind: output, shape index: {}]  }
   0x1   :  { %9 = vsyncpa [#allocation3 + $0x1], 0 }
   0x2   :  { %10 = vsyncpa [#allocation6], 0 }
   0x3   :  { %11 = vsyncpa [#allocation4], 0 }
   0x4   :  { %13 = vsyncpa [#allocation4 + $0x1], 0  ;;  %s1577_s9 = smov 0   ;;  %s1579_s10 = smov 0  }
   0x5   :  { %s1581_s11 = smov 0   ;;  %s1583_s12 = smov 0  }
   0x6   :  { %s1585_s13 = smov 0   ;;  %s1587_s14 = smov 0  }
   0x7 LB: > { %s1065_s15 = sadd.s32 4294967295, %s1551_s14   ;;  %s1066_s16 = sadd.s32 4294967294, %s1551_s14   ;;  %s1551_s14 = sphi %s1587_s14, %s19_s14   ;;  %s1547_s13 = sphi %s1585_s13, %s1795_s13   ;;  %s1543_s12 = sphi %s1583_s12, %s1794_s12   ;;  %s1539_s11 = sphi %s1581_s11, %s1793_s11   ;;  %s1535_s10 = sphi %s1579_s10, %s1792_s10   ;;  %s1531_s9 = sphi %s1577_s9, %s1791_s9  }
   0x8   : > { %p53_p0 = scmp.ne.s32.totalorder %s1535_s10, %s1531_s9  ;;  %p1611_p1 = scmp.eq.s32.totalorder %s1065_s15, 0 }
   0x9   : > { %p1615_p2 = scmp.eq.s32.totalorder %s1065_s15, 1  ;;  %p106_p3 = scmp.eq.s32.totalorder %s1066_s16, 1 }
   0xa   : > { %p1621_p4 = por %p1611_p1, %p53_p0  ;;  %p1067_p5 = scmp.ge.s32.totalorder %s1551_s14, 1 }
   0xb   : > { %p1626_p6 = por %p106_p3, %p53_p0  ;;  %p113_p7 = scmp.lt.s32.totalorder %s1551_s14, 3 }
   0xc   : > { %s1781_s19 = scalar_select %p1621_p4, 1, 0 }
   0xd   : > { %s1782_s20 = scalar_select %p1626_p6, 1, 0 }
   0xe   : > { %p1631_p8 = pnand %p1067_p5, %p113_p7  ;;  %s1553_s22 = smov [#allocation5]  }
   0xf   : > { %s125_s23 = sshll.u32 %s1553_s22, 4  ;;  %s31_s25 = sadd.s32 1, %s1547_s13  ;;  %s126_s23 = int_to_ptr.vmem [resolvable:$true] %s125_s23 }
  0x10   : > { %p1198_p9 = pneg %p1631_p8  ;;  %s1424_s26 = scalar_lea.vmem %s126_s23, 12288 }
  0x11   : > { %p1425_p13 = scmp.ne.s32.totalorder %s126_s23, %s1424_s26  ;;  %p1432_p5 = scmp.lt.s32.totalorder %s126_s23, %s126_s23 }
  0x12   : > { %p1640_p11 = pnand %p1198_p9, %p1611_p1  ;;  %p1433_p7 = scmp.lt.s32.totalorder %s1424_s26, %s1424_s26 }
  0x14   : > { %p1415_p12 = pneg %p1640_p11  ;;  %p1434_p6 = por %p1433_p7, %p1432_p5 }
  0x16   : > { %p1427_p0 = pnand %p1425_p13, %p1415_p12 }
  0x18   : > { %p1428_p3 = pneg %p1427_p0 }
  0x1a   : > { %p1435_p4 = pnand %p1434_p6, %p1428_p3 }
  0x1c   : > { %1438 = shalt.err (!%p1435_p4)
}
  0x1d   : > { %s1554_s27 = smov 384   ;;  %s1555_s28 = smov 24  }
  0x1e   : > { %1201 = dma.hbm_to_vmem [thread:$0]  (!%p1640_p11), %s1776_s1, 12288, %s126_s23, [#allocation6], %s1554_s27, %s1554_s27, %s1555_s28  }
  0x1f   : > { %p33_p6 = scmp.ge.s32.totalorder %s31_s25, 2  ;;  %s40_s3 = sadd.s32 1, %s1539_s11 }
  0x20   : > { %p47_p4 = scmp.ne.s32.totalorder %s1539_s11, %s1535_s10  ;;  %p48_p9 = scmp.eq.s32.totalorder %s1551_s14, 0 }
  0x21   : > { %s1797_s25 = smov (%p33_p6, %s31_s25), 0  ;;  %p1211_p0 = scmp.lt.s32.totalorder %s1551_s14, 2 }
  0x22   : > { %p1658_p12 = por %p48_p9, %p47_p4  ;;  %p1664_p13 = por %p1615_p2, %p47_p4 }
  0x23   : > { %s35_s6 = ssub.s32 %s1547_s13, %s1797_s25  ;;  %s139_s7 = sand.u32 1, %s1539_s11  }
  0x24   : > { %p38_p11 = scmp.eq.s32.totalorder %s35_s6, 0  ;;  %s1070_s8 = sshll.u32 %s139_s7, 5 }
  0x25   : > { %s1181_s16 = sshll.u32 %s1547_s13, 9  ;;  %s143_s26 = scalar_lea.vmem [#allocation2], %s1070_s8 }
  0x26   : > { %s1673_s15 = scalar_select %p38_p11, %s1539_s11, %s40_s3  }
  0x27   : > { %s152_s24 = scalar_lea.hbm %s1775_s0, %s1181_s16  ;;  %s153_s27 = sshll.u32 %s143_s26, 4  ;;  %s154_s27 = int_to_ptr.vmem [resolvable:$true] %s153_s27 }
  0x28   : > { %p1681_p2 = pnand %p1211_p0, %p1658_p12  ;;  %s140_s28 = scalar_lea.sflag [#allocation3], %s139_s7 }
  0x29   : > { %s1452_s29 = scalar_lea.vmem %s154_s27, 512  ;;  %s1556_s30 = smov [#allocation2]  }
  0x2a   : > { %p1441_p3 = pneg %p1681_p2  ;;  %p1453_p5 = scmp.ne.s32.totalorder %s154_s27, %s1452_s29 }
  0x2b   : > { %s1457_s3 = sshll.u32 %s1556_s30, 4  ;;  %s1458_s3 = int_to_ptr.vmem [resolvable:$false] %s1457_s3 }
  0x2c   : > { %p1455_p7 = pnand %p1453_p5, %p1441_p3  ;;  %s1459_s6 = scalar_lea.vmem %s1458_s3, 1024 }
  0x2d   : > { %p1460_p4 = scmp.lt.s32.totalorder %s154_s27, %s1458_s3  ;;  %p1461_p9 = scmp.lt.s32.totalorder %s1459_s6, %s1452_s29 }
  0x2e   : > { %p1456_p6 = pneg %p1455_p7 }
  0x2f   : > { %p1462_p11 = por %p1461_p9, %p1460_p4 }
  0x31   : > { %p1463_p10 = pnand %p1462_p11, %p1456_p6 }
  0x33   : > { %1466 = shalt.err (!%p1463_p10)
}
  0x34   : > { %s1557_s4 = smov 256   ;;  %s1558_s8 = smov 16  }
  0x35   : > { %1205 = dma.hbm_to_vmem [thread:$0]  (!%p1681_p2), %s152_s24, 512, %s154_s27, %s140_s28, %s1557_s4, %s1557_s4, %s1558_s8  }
  0x36   : > { %165 = sbr.rel (%p1631_p8) target bundleno = 406 (0x196), region = 28  ;;  %s1692_s7 = sand.u32 (!%p1631_p8), 1, %s1535_s10  }
  0x37   : > { %s1074_s16 = sshll.u32 (!%p1631_p8), %s1692_s7, 5  ;;  %s168_s22 = scalar_lea.sflag (!%p1631_p8), [#allocation3], %s1692_s7 }
  0x38   : > { %s1696_s23 = scalar_lea.vmem (!%p1631_p8), [#allocation2], %s1074_s16  ;;  %p1788_p12 = scmp.ne.s32.totalorder (!%p1631_p8), %s1781_s19, 0 }
  0x3b   : > { %1518 = dma.done.wait (%p1788_p12), %s168_s22, 512  }
  0x3c   : > { %1520 = vsyncadd (%p1788_p12), %s168_s22, 4294966784 }
  0x3d   : > { %1522 = dma.done.wait (%p1611_p1), [#allocation6], 12288  }
  0x3e   : > { %1524 = vsyncadd (%p1611_p1), [#allocation6], 4294955008  ;;  %v1269_v0 = vld [vmem:[#allocation5 + $0x154] ss:$24 sps:$4 sm:$0xff]   ;;  %v1271_v1 = vld [vmem:[#allocation5 + $0x150] ss:$24 sps:$4 sm:$0xff]  }
  0x3f   : > { %780 = vmatprep.subr.bf16.mxu0 %v1269_v0  ;;  %v1272_v2 = vld [vmem:[#allocation5 + $0x124] ss:$24 sps:$4 sm:$0xff]   ;;  %v1274_v3 = vld [vmem:[#allocation5 + $0x120] ss:$24 sps:$4 sm:$0xff]   ;;  %v1275_v4 = vld [vmem:[#allocation5 + $0xf4] ss:$24 sps:$4 sm:$0xff]  }
  0x40   : > { %781 = vmatpush1.bf16.msra.mxu0 %v1271_v1  ;;  %v1277_v5 = vld [vmem:[#allocation5 + $0xf0] ss:$24 sps:$4 sm:$0xff]   ;;  %v1278_v6 = vld [vmem:[#allocation5 + $0xc4] ss:$24 sps:$4 sm:$0xff]   ;;  %v1280_v7 = vld [vmem:[#allocation5 + $0xc0] ss:$24 sps:$4 sm:$0xff]  }
  0x41   : > { %782 = vmatprep.subr.bf16.mxu0 %v1272_v2  ;;  %v1281_v8 = vld [vmem:[#allocation5 + $0x94] ss:$24 sps:$4 sm:$0xff]   ;;  %v1283_v9 = vld [vmem:[#allocation5 + $0x90] ss:$24 sps:$4 sm:$0xff]   ;;  %v1284_v10 = vld [vmem:[#allocation5 + $0x64] ss:$24 sps:$4 sm:$0xff]  }
  0x42   : > { %v1286_v11 = vld [vmem:[#allocation5 + $0x60] ss:$24 sps:$4 sm:$0xff]   ;;  %v1287_v12 = vld [vmem:[#allocation5 + $0x34] ss:$24 sps:$4 sm:$0xff]   ;;  %v1289_v15 = vld [vmem:[#allocation5 + $0x30] ss:$24 sps:$4 sm:$0xff]  }
  0x43   : > { %v1314_v13 = vld [vmem:[#allocation5 + $0x15c] ss:$24 sps:$4 sm:$0xff]   ;;  %v1316_v14 = vld [vmem:[#allocation5 + $0x158] ss:$24 sps:$4 sm:$0xff]   ;;  %v1320_v16 = vld [vmem:[#allocation5 + $0x12c] ss:$24 sps:$4 sm:$0xff]  }
  0x44   : > { %783 = vmatpush1.bf16.msra.mxu0 %v1274_v3  ;;  %823 = vmatprep.subr.bf16.mxu1 %v1314_v13  ;;  %v199_v17 = vld [vmem:[%s1696_s23 + $0x8] sm:$0xff]  ;;  %v1290_v18 = vld [vmem:[#allocation5 + $0x4] ss:$24 sps:$4 sm:$0xff]   ;;  %v1292_v22 = vld [vmem:[#allocation5] ss:$24 sps:$4 sm:$0xff]   ;;  %s1188_s17 = smul.u32 48, %s1692_s7 }
  0x45   : > { %784 = vmatprep.subr.bf16.mxu0 %v1275_v4  ;;  %824 = vmatpush1.bf16.msra.mxu1 %v1316_v14  ;;  %v201_v19 = vld [vmem:[%s1696_s23 + $0x18] sm:$0xff]  ;;  %v1322_v20 = vld [vmem:[#allocation5 + $0x128] ss:$24 sps:$4 sm:$0xff]   ;;  %v1293_v23 = vld [vmem:[#allocation5 + $0x2d4] ss:$24 sps:$4 sm:$0xff]   ;;  %s1189_s24 = smul.u32 768, %s1543_s12 }
  0x46   : > { %825 = vmatprep.subr.bf16.mxu1 %v1320_v16  ;;  %v1708_v21 = vpack.c.bf16 %v201_v19, %v199_v17  ;;  %v1326_v24 = vld [vmem:[#allocation5 + $0xfc] ss:$24 sps:$4 sm:$0xff]   ;;  %v1328_v25 = vld [vmem:[#allocation5 + $0xf8] ss:$24 sps:$4 sm:$0xff]   ;;  %v1332_v26 = vld [vmem:[#allocation5 + $0xcc] ss:$24 sps:$4 sm:$0xff]  }
  0x47   : > { %v1295_v27 = vld [vmem:[#allocation5 + $0x2d0] ss:$24 sps:$4 sm:$0xff]   ;;  %v1296_v28 = vld [vmem:[#allocation5 + $0x2a4] ss:$24 sps:$4 sm:$0xff]   ;;  %v1298_v31 = vld [vmem:[#allocation5 + $0x2a0] ss:$24 sps:$4 sm:$0xff]   ;;  %s1727_s18 = scalar_lea.hbm %s1777_s2, %s1189_s24 }
  0x48   : > { %785 = vmatpush1.bf16.msra.mxu0 %v1277_v5  ;;  %812 = vmatprep.mubr.bf16.mxu0 %v1708_v21  ;;  %v1334_v29 = vld [vmem:[#allocation5 + $0xc8] ss:$24 sps:$4 sm:$0xff]   ;;  %v1338_v30 = vld [vmem:[#allocation5 + $0x9c] ss:$24 sps:$4 sm:$0xff]   ;;  %v1340_v33 = vld [vmem:[#allocation5 + $0x98] ss:$24 sps:$4 sm:$0xff]  }
  0x49   : > { %786 = vmatprep.subr.bf16.mxu0 %v1278_v6  ;;  %826 = vmatpush1.bf16.msra.mxu1 %v1322_v20  ;;  %v1299_v32 = vld [vmem:[#allocation5 + $0x274] ss:$24 sps:$4 sm:$0xff]   ;;  %v1301_v35 = vld [vmem:[#allocation5 + $0x270] ss:$24 sps:$4 sm:$0xff]   ;;  %v1302_v36 = vld [vmem:[#allocation5 + $0x244] ss:$24 sps:$4 sm:$0xff]  }
  0x4a   : > { %827 = vmatprep.subr.bf16.mxu1 %v1326_v24  ;;  %855 = vmatprep.mubr.bf16.mxu1 %v1708_v21  ;;  %v1344_v34 = vld [vmem:[#allocation5 + $0x6c] ss:$24 sps:$4 sm:$0xff]   ;;  %v1346_v37 = vld [vmem:[#allocation5 + $0x68] ss:$24 sps:$4 sm:$0xff]   ;;  %v1350_v38 = vld [vmem:[#allocation5 + $0x3c] ss:$24 sps:$4 sm:$0xff]  }
  0x4b   : > { %v1304_v39 = vld [vmem:[#allocation5 + $0x240] ss:$24 sps:$4 sm:$0xff]   ;;  %v1305_v40 = vld [vmem:[#allocation5 + $0x214] ss:$24 sps:$4 sm:$0xff]   ;;  %v1307_v43 = vld [vmem:[#allocation5 + $0x210] ss:$24 sps:$4 sm:$0xff]  }
  0x4c   : > { %787 = vmatpush1.bf16.msra.mxu0 %v1280_v7  ;;  %v1352_v41 = vld [vmem:[#allocation5 + $0x38] ss:$24 sps:$4 sm:$0xff]   ;;  %v1356_v42 = vld [vmem:[#allocation5 + $0xc] ss:$24 sps:$4 sm:$0xff]   ;;  %v1358_v45 = vld [vmem:[#allocation5 + $0x8] ss:$24 sps:$4 sm:$0xff]  }
  0x4d   : > { %788 = vmatprep.subr.bf16.mxu0 %v1281_v8  ;;  %828 = vmatpush1.bf16.msra.mxu1 %v1328_v25  ;;  %v1308_v44 = vld [vmem:[#allocation5 + $0x1e4] ss:$24 sps:$4 sm:$0xff]   ;;  %v1310_v47 = vld [vmem:[#allocation5 + $0x1e0] ss:$24 sps:$4 sm:$0xff]   ;;  %v1311_v48 = vld [vmem:[#allocation5 + $0x1b4] ss:$24 sps:$4 sm:$0xff]  }
  0x4e   : > { %829 = vmatprep.subr.bf16.mxu1 %v1332_v26  ;;  %v1362_v46 = vld [vmem:[#allocation5 + $0x2dc] ss:$24 sps:$4 sm:$0xff]   ;;  %v1364_v49 = vld [vmem:[#allocation5 + $0x2d8] ss:$24 sps:$4 sm:$0xff]   ;;  %v1368_v50 = vld [vmem:[#allocation5 + $0x2ac] ss:$24 sps:$4 sm:$0xff]  }
  0x4f   : > { %v1313_v51 = vld [vmem:[#allocation5 + $0x1b0] ss:$24 sps:$4 sm:$0xff]   ;;  %v1317_v52 = vld [vmem:[#allocation5 + $0x184] ss:$24 sps:$4 sm:$0xff]   ;;  %v1319_v55 = vld [vmem:[#allocation5 + $0x180] ss:$24 sps:$4 sm:$0xff]  }
  0x50   : > { %789 = vmatpush1.bf16.msra.mxu0 %v1283_v9  ;;  %v1370_v53 = vld [vmem:[#allocation5 + $0x2a8] ss:$24 sps:$4 sm:$0xff]   ;;  %v1374_v54 = vld [vmem:[#allocation5 + $0x27c] ss:$24 sps:$4 sm:$0xff]   ;;  %v1376_v59 = vld [vmem:[#allocation5 + $0x278] ss:$24 sps:$4 sm:$0xff]  }
  0x51   : > { %790 = vmatprep.subr.bf16.mxu0 %v1284_v10  ;;  %830 = vmatpush1.bf16.msra.mxu1 %v1334_v29  ;;  %v198_v56 = vld [vmem:[%s1696_s23] sm:$0xff]  ;;  %v200_v57 = vld [vmem:[%s1696_s23 + $0x10] sm:$0xff]  ;;  %s195_s19 = scalar_lea.vmem [#allocation7], %s1188_s17  ;;  %s952_s28 = scalar_lea.sflag [#allocation4], %s1692_s7 }
  0x52   : > { %831 = vmatprep.subr.bf16.mxu1 %v1338_v30  ;;  %v1325_v58 = vld [vmem:[#allocation5 + $0x164] ss:$24 sps:$4 sm:$0xff]   ;;  %v1714_v61 = vpack.c.bf16 %v200_v57, %v198_v56  ;;  %v1323_v62 = vld [vmem:[#allocation5 + $0x160] ss:$24 sps:$4 sm:$0xff]   ;;  %v1331_v63 = vld [vmem:[#allocation5 + $0x134] ss:$24 sps:$4 sm:$0xff]  }
  0x53   : > { %v1380_v60 = vld [vmem:[#allocation5 + $0x24c] ss:$24 sps:$4 sm:$0xff]   ;;  %v1382_v0 = vld [vmem:[#allocation5 + $0x248] ss:$24 sps:$4 sm:$0xff]   ;;  %v1386_v1 = vld [vmem:[#allocation5 + $0x21c] ss:$24 sps:$4 sm:$0xff]  }
  0x54   : > { %791 = vmatpush1.bf16.msra.mxu0 %v1286_v11  ;;  %v1329_v2 = vld [vmem:[#allocation5 + $0x130] ss:$24 sps:$4 sm:$0xff]   ;;  %v1337_v3 = vld [vmem:[#allocation5 + $0x104] ss:$24 sps:$4 sm:$0xff]   ;;  %v1335_v6 = vld [vmem:[#allocation5 + $0x100] ss:$24 sps:$4 sm:$0xff]  }
  0x55   : > { %792 = vmatprep.subr.bf16.mxu0 %v1287_v12  ;;  %832 = vmatpush1.bf16.msra.mxu1 %v1340_v33  ;;  %v1388_v4 = vld [vmem:[#allocation5 + $0x218] ss:$24 sps:$4 sm:$0xff]   ;;  %v1392_v5 = vld [vmem:[#allocation5 + $0x1ec] ss:$24 sps:$4 sm:$0xff]   ;;  %v1394_v8 = vld [vmem:[#allocation5 + $0x1e8] ss:$24 sps:$4 sm:$0xff]  }
  0x56   : > { %833 = vmatprep.subr.bf16.mxu1 %v1344_v34  ;;  %v1343_v7 = vld [vmem:[#allocation5 + $0xd4] ss:$24 sps:$4 sm:$0xff]   ;;  %v1341_v10 = vld [vmem:[#allocation5 + $0xd0] ss:$24 sps:$4 sm:$0xff]   ;;  %v1349_v11 = vld [vmem:[#allocation5 + $0xa4] ss:$24 sps:$4 sm:$0xff]  }
  0x57   : > { %v1398_v9 = vld [vmem:[#allocation5 + $0x1bc] ss:$24 sps:$4 sm:$0xff]   ;;  %v1400_v12 = vld [vmem:[#allocation5 + $0x1b8] ss:$24 sps:$4 sm:$0xff]   ;;  %v1404_v13 = vld [vmem:[#allocation5 + $0x18c] ss:$24 sps:$4 sm:$0xff]  }
  0x58   : > { %793 = vmatpush1.bf16.msra.mxu0 %v1289_v15  ;;  %v1347_v14 = vld [vmem:[#allocation5 + $0xa0] ss:$24 sps:$4 sm:$0xff]   ;;  %v1355_v15 = vld [vmem:[#allocation5 + $0x74] ss:$24 sps:$4 sm:$0xff]   ;;  %v1353_v17 = vld [vmem:[#allocation5 + $0x70] ss:$24 sps:$4 sm:$0xff]  }
  0x59   : > { %794 = vmatprep.subr.bf16.mxu0 %v1290_v18  ;;  %834 = vmatpush1.bf16.msra.mxu1 %v1346_v37  ;;  %v1406_v16 = vld [vmem:[#allocation5 + $0x188] ss:$24 sps:$4 sm:$0xff]   ;;  %v1361_v18 = vld [vmem:[#allocation5 + $0x44] ss:$24 sps:$4 sm:$0xff]   ;;  %v1367_v20 = vld [vmem:[#allocation5 + $0x14] ss:$24 sps:$4 sm:$0xff]  }
  0x5a   : > { %835 = vmatprep.subr.bf16.mxu1 %v1350_v38  ;;  %v1359_v19 = vld [vmem:[#allocation5 + $0x40] ss:$24 sps:$4 sm:$0xff]   ;;  %v1379_v24 = vld [vmem:[#allocation5 + $0x2b4] ss:$24 sps:$4 sm:$0xff]   ;;  %v1377_v25 = vld [vmem:[#allocation5 + $0x2b0] ss:$24 sps:$4 sm:$0xff]  }
  0x5b   : > { %v1385_v26 = vld [vmem:[#allocation5 + $0x284] ss:$24 sps:$4 sm:$0xff]   ;;  %v1389_v29 = vld [vmem:[#allocation5 + $0x250] ss:$24 sps:$4 sm:$0xff]   ;;  %s968_s21 = sshll.u32 %s195_s19, 4  ;;  %s1559_s12 = smov [#allocation7]   ;;  %s1722_s21 = int_to_ptr.vmem [resolvable:$true] %s968_s21 }
  0x5c   : > { %795 = vmatpush1.bf16.msra.mxu0 %v1292_v22  ;;  %v1373_v22 = vld [vmem:[#allocation5 + $0x2e4] ss:$24 sps:$4 sm:$0xff]   ;;  %v1401_v33 = vld [vmem:[#allocation5 + $0x1f0] ss:$24 sps:$4 sm:$0xff]   ;;  %s1467_s29 = scalar_lea.vmem %s1722_s21, 768  ;;  %s1471_s30 = sshll.u32 %s1559_s12, 4  ;;  %s1472_s30 = int_to_ptr.vmem [resolvable:$false] %s1471_s30 }
  0x5d   : > { %796 = vmatprep.subr.bf16.mxu0 %v1293_v23  ;;  %836 = vmatpush1.bf16.msra.mxu1 %v1352_v41  ;;  %v1371_v23 = vld [vmem:[#allocation5 + $0x2e0] ss:$24 sps:$4 sm:$0xff]   ;;  %v1397_v30 = vld [vmem:[#allocation5 + $0x224] ss:$24 sps:$4 sm:$0xff]   ;;  %v1410_v37 = vld [vmem:[#allocation5 + $0x190] ss:$24 sps:$4 sm:$0xff]   ;;  %p1468_p1 = scmp.ne.s32.totalorder %s1722_s21, %s1467_s29  ;;  %p1474_p0 = scmp.lt.s32.totalorder %s1722_s21, %s1472_s30 }
  0x5e   : > { %837 = vmatprep.subr.bf16.mxu1 %v1356_v42  ;;  %v1409_v34 = vld [vmem:[#allocation5 + $0x1c4] ss:$24 sps:$4 sm:$0xff]   ;;  %s1473_s3 = scalar_lea.vmem %s1472_s30, 1536 }
  0x5f   : > { %p1469_p8 = pnand %p1468_p1, %p1664_p13  ;;  %p1475_p2 = scmp.lt.s32.totalorder %s1473_s3, %s1467_s29 }
  0x60   : > { %797 = vmatpush2.bf16.msra.mxu0 %v1295_v27  ;;  %v1383_v27 = vld [vmem:[#allocation5 + $0x280] ss:$24 sps:$4 sm:$0xff]  }
  0x61   : > { %798 = vmatprep.subr.bf16.mxu0 %v1296_v28  ;;  %838 = vmatpush1.bf16.msra.mxu1 %v1358_v45  ;;  %v1391_v28 = vld [vmem:[#allocation5 + $0x254] ss:$24 sps:$4 sm:$0xff]   ;;  %p1470_p10 = pneg %p1469_p8  ;;  %p1476_p3 = por %p1475_p2, %p1474_p0 }
  0x62   : > { %839 = vmatprep.subr.bf16.mxu1 %v1362_v46 }
  0x63   : > { %p1477_p5 = pnand %p1476_p3, %p1470_p10 }
  0x64   : > { %799 = vmatpush2.bf16.msra.mxu0 %v1298_v31  ;;  %v1395_v31 = vld [vmem:[#allocation5 + $0x220] ss:$24 sps:$4 sm:$0xff]  }
  0x65   : > { %800 = vmatprep.subr.bf16.mxu0 %v1299_v32  ;;  %840 = vmatpush2.bf16.msra.mxu1 %v1364_v49  ;;  %v1403_v32 = vld [vmem:[#allocation5 + $0x1f4] ss:$24 sps:$4 sm:$0xff]  }
  0x66   : > { %841 = vmatprep.subr.bf16.mxu1 %v1368_v50 }
  0x68   : > { %801 = vmatpush2.bf16.msra.mxu0 %v1301_v35  ;;  %v1407_v35 = vld [vmem:[#allocation5 + $0x1c0] ss:$24 sps:$4 sm:$0xff]  }
  0x69   : > { %802 = vmatprep.subr.bf16.mxu0 %v1302_v36  ;;  %842 = vmatpush2.bf16.msra.mxu1 %v1370_v53  ;;  %v1412_v36 = vld [vmem:[#allocation5 + $0x194] ss:$24 sps:$4 sm:$0xff]  }
  0x6a   : > { %843 = vmatprep.subr.bf16.mxu1 %v1374_v54 }
  0x6c   : > { %803 = vmatpush2.bf16.msra.mxu0 %v1304_v39 }
  0x6d   : > { %804 = vmatprep.subr.bf16.mxu0 %v1305_v40  ;;  %844 = vmatpush2.bf16.msra.mxu1 %v1376_v59 }
  0x6e   : > { %845 = vmatprep.subr.bf16.mxu1 %v1380_v60 }
  0x70   : > { %805 = vmatpush2.bf16.msra.mxu0 %v1307_v43 }
  0x71   : > { %806 = vmatprep.subr.bf16.mxu0 %v1308_v44  ;;  %846 = vmatpush2.bf16.msra.mxu1 %v1382_v0 }
  0x72   : > { %847 = vmatprep.subr.bf16.mxu1 %v1386_v1 }
  0x74   : > { %807 = vmatpush2.bf16.msra.mxu0 %v1310_v47 }
  0x75   : > { %808 = vmatprep.subr.bf16.mxu0 %v1311_v48  ;;  %848 = vmatpush2.bf16.msra.mxu1 %v1388_v4 }
  0x76   : > { %849 = vmatprep.subr.bf16.mxu1 %v1392_v5 }
  0x78   : > { %809 = vmatpush2.bf16.msra.mxu0 %v1313_v51 }
  0x79   : > { %810 = vmatprep.subr.bf16.mxu0 %v1317_v52  ;;  %850 = vmatpush2.bf16.msra.mxu1 %v1394_v8 }
  0x7a   : > { %851 = vmatprep.subr.bf16.mxu1 %v1398_v9 }
  0x7c   : > { %811 = vmatpush2.bf16.msra.mxu0 %v1319_v55 }
  0x7d   : > { %866 = vmatprep.subr.bf16.mxu0 %v1325_v58  ;;  %852 = vmatpush2.bf16.msra.mxu1 %v1400_v12 }
  0x7e   : > { %853 = vmatprep.subr.bf16.mxu1 %v1404_v13 }
  0x7f   : > { %813 = vmatmul.mubr.bf16.vlgmr.msra.gmra.mxu0 %v1714_v61 }
  0x80   : > { %867 = vmatpush1.bf16.msra.mxu0 %v1323_v62  ;;  %898 = vmatprep.mubr.bf16.mxu0 %v1708_v21  ;;  %v1365_v21 = vld [vmem:[#allocation5 + $0x10] ss:$24 sps:$4 sm:$0xff]  }
  0x81   : > { %868 = vmatprep.subr.bf16.mxu0 %v1331_v63  ;;  %854 = vmatpush2.bf16.msra.mxu1 %v1406_v16 }
  0x84   : > { %869 = vmatpush1.bf16.msra.mxu0 %v1329_v2  ;;  %856 = vmatmul.mubr.bf16.vlgmr.msra.gmra.mxu1 %v1714_v61 }
  0x85   : > { %870 = vmatprep.subr.bf16.mxu0 %v1337_v3 }
  0x88   : > { %871 = vmatpush1.bf16.msra.mxu0 %v1335_v6 }
  0x89   : > { %872 = vmatprep.subr.bf16.mxu0 %v1343_v7 }
  0x8c   : > { %873 = vmatpush1.bf16.msra.mxu0 %v1341_v10 }
  0x8d   : > { %874 = vmatprep.subr.bf16.mxu0 %v1349_v11 }
  0x90   : > { %875 = vmatpush1.bf16.msra.mxu0 %v1347_v14 }
  0x91   : > { %876 = vmatprep.subr.bf16.mxu0 %v1355_v15 }
  0x94   : > { %877 = vmatpush1.bf16.msra.mxu0 %v1353_v17 }
  0x95   : > { %878 = vmatprep.subr.bf16.mxu0 %v1361_v18 }
  0x98   : > { %879 = vmatpush1.bf16.msra.mxu0 %v1359_v19 }
  0x99   : > { %880 = vmatprep.subr.bf16.mxu0 %v1367_v20 }
  0x9c   : > { %881 = vmatpush1.bf16.msra.mxu0 %v1365_v21 }
  0x9d   : > { %882 = vmatprep.subr.bf16.mxu0 %v1373_v22 }
  0xa0   : > { %883 = vmatpush2.bf16.msra.mxu0 %v1371_v23 }
  0xa1   : > { %884 = vmatprep.subr.bf16.mxu0 %v1379_v24 }
  0xa4   : > { %885 = vmatpush2.bf16.msra.mxu0 %v1377_v25 }
  0xa5   : > { %886 = vmatprep.subr.bf16.mxu0 %v1385_v26 }
  0xa8   : > { %887 = vmatpush2.bf16.msra.mxu0 %v1383_v27 }
  0xa9   : > { %888 = vmatprep.subr.bf16.mxu0 %v1391_v28 }
  0xac   : > { %889 = vmatpush2.bf16.msra.mxu0 %v1389_v29 }
  0xad   : > { %890 = vmatprep.subr.bf16.mxu0 %v1397_v30 }
  0xb0   : > { %891 = vmatpush2.bf16.msra.mxu0 %v1395_v31 }
  0xb1   : > { %892 = vmatprep.subr.bf16.mxu0 %v1403_v32 }
  0xb4   : > { %893 = vmatpush2.bf16.msra.mxu0 %v1401_v33 }
  0xb5   : > { %894 = vmatprep.subr.bf16.mxu0 %v1409_v34 }
  0xb8   : > { %895 = vmatpush2.bf16.msra.mxu0 %v1407_v35 }
  0xb9   : > { %896 = vmatprep.subr.bf16.mxu0 %v1412_v36 }
  0xbc   : > { %897 = vmatpush2.bf16.msra.mxu0 %v1410_v37 }
  0xbf   : > { %899 = vmatmul.mubr.bf16.vlgmr.msra.gmra.mxu0 %v1714_v61 }
 0x13f   : > { %v814_v38 = vpop.f32.mrf.mxu0 }
 0x141   : > { %v816_v39 = vpop.f32.mrf.mxu0 }
 0x142   : > { %v1182_v40 = vpack.c.bf16 %v816_v39, %v814_v38 }
 0x143   : > { %v818_v41 = vpop.f32.mrf.mxu0 }
 0x144   : > { %945 = vst [vmem:[%s195_s19] sm:$0xff] %v1182_v40  ;;  %v857_v44 = vpop.f32.mrf.mxu1 }
 0x145   : > { %v820_v42 = vpop.f32.mrf.mxu0 }
 0x146   : > { %v1185_v43 = vpack.c.bf16 %v820_v42, %v818_v41  ;;  %v859_v45 = vpop.f32.mrf.mxu1 }
 0x147   : > { %v1183_v46 = vpack.c.bf16 %v859_v45, %v857_v44 }
 0x148   : > { %948 = vst [vmem:[%s195_s19 + $0x18] sm:$0xff] %v1185_v43  ;;  %v861_v47 = vpop.f32.mrf.mxu1 }
 0x149   : > { %946 = vst [vmem:[%s195_s19 + $0x8] sm:$0xff] %v1183_v46 }
 0x14a   : > { %v863_v48 = vpop.f32.mrf.mxu1 }
 0x14b   : > { %v1186_v49 = vpack.c.bf16 %v863_v48, %v861_v47 }
 0x14d   : > { %949 = vst [vmem:[%s195_s19 + $0x20] sm:$0xff] %v1186_v49 }
 0x17f   : > { %v900_v50 = vpop.f32.mrf.mxu0 }
 0x181   : > { %v902_v51 = vpop.f32.mrf.mxu0 }
 0x182   : > { %v1184_v52 = vpack.c.bf16 %v902_v51, %v900_v50 }
 0x183   : > { %v904_v53 = vpop.f32.mrf.mxu0 }
 0x184   : > { %947 = vst [vmem:[%s195_s19 + $0x10] sm:$0xff] %v1184_v52 }
 0x185   : > { %v906_v54 = vpop.f32.mrf.mxu0 }
 0x186   : > { %v1187_v55 = vpack.c.bf16 %v906_v54, %v904_v53 }
 0x188   : > { %950 = vst [vmem:[%s195_s19 + $0x28] sm:$0xff] %v1187_v55 }
 0x189   : > { %1480 = shalt.err (!%p1477_p5)
}
 0x18a   : > { %s1481_s6 = scalar_lea.hbm %s1727_s18, 768  ;;  %s1485_s16 = scalar_lea.hbm %s1777_s2, 1536 }
 0x18b   : > { %p1482_p7 = scmp.ne.s32.totalorder %s1727_s18, %s1481_s6  ;;  %p1486_p9 = scmp.lt.s32.totalorder %s1727_s18, %s1777_s2 }
 0x18c   : > { %p1487_p11 = scmp.lt.s32.totalorder %s1485_s16, %s1481_s6 }
 0x18d   : > { %p1483_p6 = pnand %p1482_p7, %p1664_p13 }
 0x18e   : > { %p1488_p12 = por %p1487_p11, %p1486_p9 }
 0x18f   : > { %p1484_p4 = pneg %p1483_p6 }
 0x191   : > { %p1489_p1 = pnand %p1488_p12, %p1484_p4 }
 0x193   : > { %1492 = shalt.err (!%p1489_p1)
}
 0x194   : > { %s1560_s17 = smov 384   ;;  %s1561_s19 = smov 24  }
 0x195   : > { %1196 = dma.vmem_to_hbm [thread:$0]  (%p1664_p13), %s1722_s21, 768, %s1727_s18, %s952_s28, %s1560_s17, %s1560_s17, %s1561_s19  }
 0x196 PF: > { %s983_s24 = sand.u32 1, %s1531_s9   ;;  %p1789_p8 = scmp.ne.s32.totalorder %s1782_s20, 0 }
 0x197   : > { %p1790_p10 = scmp.ge.s32.totalorder %s1551_s14, 2  ;;  %s984_s26 = scalar_lea.sflag [#allocation4], %s983_s24 }
 0x199   : > { %p1207_p0 = pnand %p1790_p10, %p1789_p8 }
 0x19b   : > { %p1208_p2 = pneg %p1207_p0 }
 0x19d   : > { %1526 = dma.done.wait (%p1208_p2), %s984_s26, 768  }
 0x19e   : > { %1528 = vsyncadd (%p1208_p2), %s984_s26, 4294966528  ;;  %s19_s14 = sadd.s32 1, %s1551_s14   ;;  %s1791_s9 = smov %s1535_s10 }
 0x19f   : > { %p16_p3 = scmp.ge.s32.totalorder %s19_s14, 4   ;;  %s1792_s10 = smov %s1539_s11 }
 0x1a0   : > { %s1793_s11 = smov %s1673_s15  ;;  %s1794_s12 = smov %s1547_s13 }
 0x1a1   : > { %s1795_s13 = smov %s1797_s25  ;;  %18 = sbr.rel (!%p16_p3) target bundleno = 7 (0x7), region = 77 }
 0x1a6   :  { %989 = vsyncpa [#allocation3], 1 }
 0x1a7   :  { %991 = vsyncpa [#allocation3 + $0x1], 1 }
 0x1a8   :  { %992 = vsyncpa [#allocation6], 1 }
 0x1a9   :  { %993 = vsyncpa [#allocation4], 1 }
 0x1aa   :  { %995 = vsyncpa [#allocation4 + $0x1], 1 }

</bundles_post_ra>
